<compile_context>
chip_gen: v7x
topology: tpu7x:2x2x1
jax: 0.10.0
libtpu: 0.0.40
codegen_flags: <defaults>
</compile_context>

<pallas_src>
import functools

import jax
import jax.numpy as jnp
from jax import lax
from jax.experimental import pallas as pl
from jax.experimental.pallas import tpu as pltpu


def _focal_loss_kernel(x_ref, tgt_ref, alpha_ref, out_ref, *, gamma, hw,
                       tile_hw):
    """One grid step: one batch element x one tile of `tile_hw` pixels.

    x_ref:     (1, C, tile_hw) logits (classes on sublanes, pixels on lanes)
    tgt_ref:   (1, 1, tile_hw) int32 targets
    alpha_ref: (C, 1) per-class weights (resident across the grid)
    out_ref:   (1, 1, 1, 128) partial sums for this tile
    """
    p = pl.program_id(1)

    x = x_ref[0].astype(jnp.float32)            # (C, tile_hw)
    tgt = tgt_ref[0]                            # (1, tile_hw) int32
    alpha = alpha_ref[...].astype(jnp.float32)  # (C, 1)
    c = x.shape[0]

    needs_mask = (hw % tile_hw) != 0            # static (Python) decision
    if needs_mask:
        lane = lax.broadcasted_iota(jnp.int32, (1, tile_hw), 1)
        valid = (p * tile_hw + lane) < hw       # (1, tile_hw) bool
        # Zero padded lanes BEFORE any transcendental so stale VMEM bits
        # (possibly NaN/Inf) can never poison the tile.
        x = jnp.where(valid, x, 0.0)

    # --- log_softmax over classes (sublane axis) ---
    m = jnp.max(x, axis=0, keepdims=True)                      # (1, tile_hw)
    z = x - m
    lse = jnp.log(jnp.sum(jnp.exp(z), axis=0, keepdims=True))   # (1, tile_hw)
    logp = z - lse                                              # (C, tile_hw)

    # --- gather logpt / alpha at target via one-hot reduce over classes ---
    cls = lax.broadcasted_iota(jnp.int32, (c, tile_hw), 0)
    onehot = (cls == tgt).astype(jnp.float32)                   # (C, tile_hw)

    logpt = jnp.sum(logp * onehot, axis=0, keepdims=True)       # (1, tile_hw)
    at = jnp.sum(alpha * onehot, axis=0, keepdims=True)         # (1, tile_hw)

    pt = jnp.exp(logpt)
    if float(gamma) == int(gamma):
        # integer-power fast path (VPU multiplies; no log/exp, no NaN risk)
        focal = lax.integer_pow(1.0 - pt, int(gamma))
    else:
        focal = jnp.power(jnp.maximum(1.0 - pt, 0.0), gamma)
    loss = -focal * at * logpt                                  # (1, tile_hw)

    if needs_mask:
        loss = jnp.where(valid, loss, 0.0)

    # --- reduce to a lane-dense (1, 128) per-tile partial (defer scalar sum) ---
    if tile_hw % 128 == 0:
        part = loss[:, 0:128]
        for k in range(1, tile_hw // 128):
            part = part + loss[:, k * 128:(k + 1) * 128]        # VPU adds only
    else:
        # Only reachable when tile_hw == HW and HW is not a multiple of 128.
        lane128 = lax.broadcasted_iota(jnp.int32, (1, 128), 1)
        part = jnp.where(lane128 == 0, jnp.sum(loss), 0.0)

    out_ref[...] = part.reshape(1, 1, 1, 128)


def _pick_tile_hw(hw, c):
    """Largest lane-dense pixel tile that keeps double-buffered VMEM modest."""
    budget_bytes = 2 * 1024 * 1024            # per (C, tile_hw) f32 slab
    t = budget_bytes // max(c * 4, 4)
    t = max(128, min(int(t), 16384))
    t = (t // 128) * 128
    return hw if hw <= t else t               # full extent is always legal


def _normalize_alpha(alpha, num_classes):
    """Mirror the PyTorch module's alpha handling."""
    if alpha is None:
        return jnp.ones((num_classes,), jnp.float32)
    if isinstance(alpha, (float, int)):
        a = float(alpha)
        return jnp.array([a, 1.0 - a], jnp.float32)
    return jnp.asarray(alpha, jnp.float32)


def focal_loss_pallas(x, target, alpha=None, gamma=2.0, size_average=True,
                      tile_hw=None):
    """x: (B, C, H, W) float logits (NCHW, like PyTorch); target: (B, H, W) int.

    alpha: None, scalar (binary case -> [alpha, 1-alpha]) or (C,) per-class
    weights. Returns a scalar (mean if size_average else sum).
    """
    B, C, H, W = x.shape
    HW = H * W

    # Contiguous reshape only -- no transpose, no extra HBM copy.
    x3 = x.reshape(B, C, HW)
    t3 = target.reshape(B, 1, HW).astype(jnp.int32)

    alpha_arr = _normalize_alpha(alpha, C)
    assert alpha_arr.shape[0] == C, "alpha length must match channel count"
    alpha2 = alpha_arr.reshape(C, 1)

    if tile_hw is None:
        tile_hw = _pick_tile_hw(HW, C)
    grid_p = pl.cdiv(HW, tile_hw)
    grid = (B, grid_p)

    kernel = functools.partial(_focal_loss_kernel, gamma=float(gamma),
                               hw=HW, tile_hw=tile_hw)

    itemsize = jnp.dtype(x.dtype).itemsize
    cost = pl.CostEstimate(
        flops=int(8 * B * HW * C),
        transcendentals=int(B * HW * (C + 2)),
        bytes_accessed=int(B * C * HW * itemsize + B * HW * 4
                           + B * grid_p * 128 * 4 + C * 4),
    )

    partials = pl.pallas_call(
        kernel,
        out_shape=jax.ShapeDtypeStruct((B, grid_p, 1, 128), jnp.float32),
        grid_spec=pltpu.PrefetchScalarGridSpec(
            num_scalar_prefetch=0,
            grid=grid,
            in_specs=[
                # logits tile: classes on sublanes, pixels on lanes
                pl.BlockSpec((1, C, tile_hw), lambda b, p: (b, 0, p)),
                # targets tile
                pl.BlockSpec((1, 1, tile_hw), lambda b, p: (b, 0, p)),
                # alpha, resident across the whole grid
                pl.BlockSpec((C, 1), lambda b, p: (0, 0)),
            ],
            out_specs=pl.BlockSpec((1, 1, 1, 128),
                                   lambda b, p: (b, p, 0, 0)),
        ),
        compiler_params=pltpu.CompilerParams(
            dimension_semantics=("parallel", "parallel"),
            vmem_limit_bytes=32 * 1024 * 1024,
        ),
        cost_estimate=cost,
    )(x3, t3, alpha2)

    total = jnp.sum(partials)
    if size_average:
        return total / jnp.float32(B * HW)
    return total


def focal_loss_ref(x, target, alpha=None, gamma=2.0, size_average=True):
    """Pure-JAX reference mirroring the PyTorch forward."""
    B, C, H, W = x.shape
    x2 = jnp.transpose(x.reshape(B, C, H * W), (0, 2, 1)).reshape(-1, C)
    t2 = target.reshape(-1).astype(jnp.int32)
    logp = jax.nn.log_softmax(x2.astype(jnp.float32), axis=1)
    logpt = jnp.take_along_axis(logp, t2[:, None], axis=1)[:, 0]
    pt = jnp.exp(logpt)
    if alpha is not None:
        a = _normalize_alpha(alpha, C)
        at = a[t2]
        logpt = logpt * at
    loss = -1.0 * (1.0 - pt) ** gamma * logpt
    return loss.mean() if size_average else loss.sum()


if __name__ == "__main__":
    key = jax.random.PRNGKey(0)

    # --- test 1: module-style shapes (NCHW), integer gamma, alpha list ---
    k1, k2 = jax.random.split(key)
    B, C, H, W = 2, 4, 16, 16
    x = jax.random.normal(k1, (B, C, H, W), dtype=jnp.float32)
    target = jax.random.randint(k2, (B, H, W), 0, C, dtype=jnp.int32)
    alpha = jnp.array([0.25, 0.5, 0.75, 1.0], dtype=jnp.float32)

    out = focal_loss_pallas(x, target, alpha, gamma=2.0, size_average=True)
    out = jax.block_until_ready(out)
    ref = focal_loss_ref(x, target, alpha, gamma=2.0, size_average=True)
    assert jnp.allclose(out, ref, rtol=1e-5, atol=1e-5), (out, ref)

    # --- test 2: ragged HW (masking path), non-pow2 C, fractional gamma,
    #             alpha=None, sum reduction, forced small tile ---
    k3, k4 = jax.random.split(k1)
    B2, C2, H2, W2 = 2, 5, 13, 13
    x2 = jax.random.normal(k3, (B2, C2, H2, W2), dtype=jnp.float32)
    t2 = jax.random.randint(k4, (B2, H2, W2), 0, C2, dtype=jnp.int32)

    out2 = focal_loss_pallas(x2, t2, alpha=None, gamma=2.5,
                             size_average=False, tile_hw=128)
    out2 = jax.block_until_ready(out2)
    ref2 = focal_loss_ref(x2, t2, alpha=None, gamma=2.5, size_average=False)
    assert jnp.allclose(out2, ref2, rtol=1e-4, atol=1e-4), (out2, ref2)

    # --- test 3: scalar alpha (binary case), gamma=0 (module default) ---
    k5, k6 = jax.random.split(k3)
    x3 = jax.random.normal(k5, (2, 2, 8, 8), dtype=jnp.float32)
    t3 = jax.random.randint(k6, (2, 8, 8), 0, 2, dtype=jnp.int32)
    out3 = focal_loss_pallas(x3, t3, alpha=0.25, gamma=0.0, size_average=True)
    out3 = jax.block_until_ready(out3)
    ref3 = focal_loss_ref(x3, t3, alpha=0.25, gamma=0.0, size_average=True)
    assert jnp.allclose(out3, ref3, rtol=1e-5, atol=1e-5), (out3, ref3)

    print("KERNEL_OK")
</pallas_src>

<mosaic_0001>
module attributes {stable_mosaic.version = 11 : i64} {
  func.func @_focal_loss_kernel(%arg0: i32, %arg1: i32, %arg2: memref<1x4x256xf32, #tpu.memory_space<vmem>>, %arg3: memref<1x1x256xi32, #tpu.memory_space<vmem>>, %arg4: memref<4x1xf32, #tpu.memory_space<vmem>>, %arg5: memref<1x1x1x128xf32, #tpu.memory_space<vmem>>) attributes {dimension_semantics = [#tpu.dimension_semantics<parallel>, #tpu.dimension_semantics<parallel>], iteration_bounds = array<i64: 2, 1>, scalar_prefetch = 0 : i64, scratch_operands = 0 : i64, tpu.core_type = #tpu.core_type<tc>, window_params = [{transform_indices = @transform_0, window_bounds = array<i64: 1, 4, 256>}, {transform_indices = @transform_1, window_bounds = array<i64: 1, 1, 256>}, {pipeline_mode = #tpu.pipeline_mode<synchronous>, transform_indices = @transform_2, window_bounds = array<i64: 4, 1>}, {transform_indices = @transform_3, window_bounds = array<i64: 1, 1, 1, 128>}]} {
    %c0 = arith.constant 0 : index
    %c0_0 = arith.constant 0 : index
    %c0_1 = arith.constant 0 : index
    %0 = vector.load %arg2[%c0, %c0_0, %c0_1] : memref<1x4x256xf32, #tpu.memory_space<vmem>>, vector<1x4x256xf32>
    %1 = vector.shape_cast %0 : vector<1x4x256xf32> to vector<4x256xf32>
    %c0_2 = arith.constant 0 : index
    %c0_3 = arith.constant 0 : index
    %c0_4 = arith.constant 0 : index
    %2 = vector.load %arg3[%c0_2, %c0_3, %c0_4] : memref<1x1x256xi32, #tpu.memory_space<vmem>>, vector<1x1x256xi32>
    %3 = vector.shape_cast %2 : vector<1x1x256xi32> to vector<1x256xi32>
    %c0_5 = arith.constant 0 : index
    %c0_6 = arith.constant 0 : index
    %4 = vector.load %arg4[%c0_5, %c0_6] : memref<4x1xf32, #tpu.memory_space<vmem>>, vector<4x1xf32>
    %cst = arith.constant dense<0xFF800000> : vector<256xf32>
    %5 = vector.multi_reduction <maximumf>, %1, %cst [0] : vector<4x256xf32> to vector<256xf32>
    %6 = vector.shape_cast %5 : vector<256xf32> to vector<1x256xf32>
    %7 = vector.broadcast %6 : vector<1x256xf32> to vector<4x256xf32>
    %8 = arith.subf %1, %7 : vector<4x256xf32>
    %9 = math.exp %8 : vector<4x256xf32>
    %cst_7 = arith.constant dense<0.000000e+00> : vector<256xf32>
    %10 = vector.multi_reduction <add>, %9, %cst_7 [0] : vector<4x256xf32> to vector<256xf32>
    %11 = vector.shape_cast %10 : vector<256xf32> to vector<1x256xf32>
    %12 = math.log %11 : vector<1x256xf32>
    %13 = vector.broadcast %12 : vector<1x256xf32> to vector<4x256xf32>
    %14 = arith.subf %8, %13 : vector<4x256xf32>
    %15 = tpu.iota {dimensions = array<i32: 0>} : vector<4x256xi32>
    %16 = vector.broadcast %3 : vector<1x256xi32> to vector<4x256xi32>
    %17 = arith.cmpi eq, %15, %16 : vector<4x256xi32>
    %18 = arith.extui %17 : vector<4x256xi1> to vector<4x256xi32>
    %19 = arith.sitofp %18 : vector<4x256xi32> to vector<4x256xf32>
    %20 = arith.mulf %14, %19 : vector<4x256xf32>
    %cst_8 = arith.constant dense<0.000000e+00> : vector<256xf32>
    %21 = vector.multi_reduction <add>, %20, %cst_8 [0] : vector<4x256xf32> to vector<256xf32>
    %22 = vector.shape_cast %21 : vector<256xf32> to vector<1x256xf32>
    %23 = vector.broadcast %4 : vector<4x1xf32> to vector<4x256xf32>
    %24 = arith.mulf %23, %19 : vector<4x256xf32>
    %cst_9 = arith.constant dense<0.000000e+00> : vector<256xf32>
    %25 = vector.multi_reduction <add>, %24, %cst_9 [0] : vector<4x256xf32> to vector<256xf32>
    %26 = vector.shape_cast %25 : vector<256xf32> to vector<1x256xf32>
    %27 = math.exp %22 : vector<1x256xf32>
    %cst_10 = arith.constant 1.000000e+00 : f32
    %28 = vector.broadcast %cst_10 : f32 to vector<1x256xf32>
    %29 = arith.subf %28, %27 : vector<1x256xf32>
    %30 = arith.mulf %29, %29 : vector<1x256xf32>
    %cst_11 = arith.constant 0.000000e+00 : f32
    %31 = vector.broadcast %cst_11 : f32 to vector<1x256xf32>
    %32 = arith.subf %31, %30 : vector<1x256xf32>
    %33 = arith.mulf %32, %26 : vector<1x256xf32>
    %34 = arith.mulf %33, %22 : vector<1x256xf32>
    %35 = vector.extract_strided_slice %34 {offsets = [0, 0], sizes = [1, 128], strides = [1, 1]} : vector<1x256xf32> to vector<1x128xf32>
    %36 = vector.extract_strided_slice %34 {offsets = [0, 128], sizes = [1, 128], strides = [1, 1]} : vector<1x256xf32> to vector<1x128xf32>
    %37 = arith.addf %35, %36 : vector<1x128xf32>
    %38 = vector.shape_cast %37 : vector<1x128xf32> to vector<1x1x1x128xf32>
    %c0_12 = arith.constant 0 : index
    %c0_13 = arith.constant 0 : index
    %c0_14 = arith.constant 0 : index
    %c0_15 = arith.constant 0 : index
    %39 = vector.load %arg5[%c0_12, %c0_13, %c0_14, %c0_15] : memref<1x1x1x128xf32, #tpu.memory_space<vmem>>, vector<1x1x1x128xf32>
    tpu.vector_store %arg5[%c0_12, %c0_13, %c0_14, %c0_15], %38 {strides = array<i32>} : memref<1x1x1x128xf32, #tpu.memory_space<vmem>>, vector<1x1x1x128xf32>,
    return
  }
  func.func @transform_0(%arg0: i32, %arg1: i32) -> (i32, i32, i32) {
    %c0_i32 = arith.constant 0 : i32
    %c0_i32_0 = arith.constant 0 : i32
    return %arg0, %c0_i32, %arg1 : i32, i32, i32
  }
  func.func @transform_1(%arg0: i32, %arg1: i32) -> (i32, i32, i32) {
    %c0_i32 = arith.constant 0 : i32
    %c0_i32_0 = arith.constant 0 : i32
    return %arg0, %c0_i32, %arg1 : i32, i32, i32
  }
  func.func @transform_2(%arg0: i32, %arg1: i32) -> (i32, i32) {
    %c0_i32 = arith.constant 0 : i32
    %c0_i32_0 = arith.constant 0 : i32
    %c0_i32_1 = arith.constant 0 : i32
    return %c0_i32, %c0_i32_0 : i32, i32
  }
  func.func @transform_3(%arg0: i32, %arg1: i32) -> (i32, i32, i32, i32) {
    %c0_i32 = arith.constant 0 : i32
    %c0_i32_0 = arith.constant 0 : i32
    %c0_i32_1 = arith.constant 0 : i32
    return %arg0, %arg1, %c0_i32, %c0_i32_0 : i32, i32, i32, i32
  }
}

</mosaic_0001>

<bundles_post_ra>
// kernel: tpu_custom_call.1
= control target key start
LH: loop header
LB: loop body
LE: loop exit
PB: predicated region body
PF: predicated region fallthrough
CT: control target
= control target key end

     0   :  { %8 = vsyncpa [#allocation3], 0  ;;  %s893_s0 = inlined_call_operand.hbm [shape: f32[2,4,256], index: 0, kind: input, shape index: {}]   ;;  %s894_s1 = inlined_call_operand.vmem [shape: s32[2,1,256], index: 1, kind: input, shape index: {}]   ;;  %s895_s2 = inlined_call_operand.vmem [shape: f32[4,1], index: 2, kind: input, shape index: {}]   ;;  %s896_s3 = inlined_call_operand.hbm [shape: f32[2,1,1,128], index: 3, kind: output, shape index: {}]  }
   0x1   :  { %10 = vsyncpa [#allocation3 + $0x1], 0 }
   0x2   :  { %11 = vsyncpa [#allocation4], 0 }
   0x3   :  { %13 = vsyncpa [#allocation4 + $0x1], 0  ;;  %s704_s12 = smov 0   ;;  %s706_s13 = smov 0  }
   0x4   :  { %s708_s14 = smov 0   ;;  %s710_s15 = smov 0  }
   0x5   :  { %s712_s16 = smov 0   ;;  %s714_s17 = smov 0  }
   0x6 LB: > { %s474_s18 = sadd.s32 4294967295, %s678_s17   ;;  %s475_s19 = sadd.s32 4294967294, %s678_s17   ;;  %s678_s17 = sphi %s714_s17, %s19_s17   ;;  %s674_s16 = sphi %s712_s16, %s912_s16   ;;  %s670_s15 = sphi %s710_s15, %s911_s15   ;;  %s666_s14 = sphi %s708_s14, %s910_s14   ;;  %s662_s13 = sphi %s706_s13, %s909_s13   ;;  %s658_s12 = sphi %s704_s12, %s908_s12  }
   0x7   : > { %s31_s20 = sadd.s32 1, %s674_s16  ;;  %s40_s21 = sadd.s32 1, %s666_s14 }
   0x8   : > { %p33_p0 = scmp.ge.s32.totalorder %s31_s20, 2  ;;  %p47_p1 = scmp.ne.s32.totalorder %s666_s14, %s662_s13 }
   0x9   : > { %p48_p2 = scmp.eq.s32.totalorder %s678_s17, 0  ;;  %p53_p3 = scmp.ne.s32.totalorder %s662_s13, %s658_s12 }
   0xa   : > { %s914_s20 = smov (%p33_p0, %s31_s20), 0  ;;  %p54_p5 = scmp.eq.s32.totalorder %s474_s18, 0 }
   0xb   : > { %p745_p4 = por %p48_p2, %p47_p1  ;;  %s35_s23 = ssub.s32 %s674_s16, %s914_s20 }
   0xc   : > { %p128_p6 = scmp.eq.s32.totalorder %s474_s18, 1  ;;  %p38_p7 = scmp.eq.s32.totalorder %s35_s23, 0 }
   0xd   : > { %p751_p8 = por %p54_p5, %p53_p3  ;;  %p134_p10 = scmp.eq.s32.totalorder %s475_s19, 1 }
   0xe   : > { %p755_p9 = por %p128_p6, %p47_p1  ;;  %p502_p13 = scmp.lt.s32.totalorder %s678_s17, 2 }
   0xf   : > { %s760_s26 = scalar_select %p38_p7, %s666_s14, %s40_s21  }
  0x10   : > { %s900_s25 = scalar_select %p755_p9, 1, 0 }
  0x11   : > { %p762_p11 = por %p134_p10, %p53_p3  ;;  %s157_s28 = sand.u32 1, %s666_s14  }
  0x12   : > { %s478_s29 = sshll.u32 %s157_s28, 3  ;;  %s489_s30 = sshll.u32 %s674_s16, 7 }
  0x13   : > { %s901_s27 = scalar_select %p762_p11, 1, 0 }
  0x14   : > { %s773_s6 = scalar_lea.hbm %s893_s0, %s489_s30  ;;  %s161_s7 = scalar_lea.vmem [#allocation2], %s478_s29 }
  0x15   : > { %s171_s8 = sshll.u32 %s161_s7, 4  ;;  %p779_p0 = pnand %p502_p13, %p745_p4  ;;  %s775_s8 = int_to_ptr.vmem [resolvable:$true] %s171_s8 }
  0x16   : > { %s158_s10 = scalar_lea.sflag [#allocation3], %s157_s28  ;;  %s566_s11 = scalar_lea.hbm %s773_s6, 128 }
  0x17   : > { %p567_p3 = scmp.ne.s32.totalorder %s773_s6, %s566_s11  ;;  %p568_p5 = pneg %p779_p0 }
  0x18   : > { %s571_s21 = scalar_lea.hbm %s893_s0, 256  ;;  %p572_p4 = scmp.lt.u32.totalorder %s773_s6, %s893_s0 }
  0x19   : > { %p569_p6 = pnand %p568_p5, %p567_p3  ;;  %p573_p10 = scmp.lt.u32.totalorder %s571_s21, %s566_s11 }
  0x1a   : > { %p575_p12 = scmp.lt.u32.totalorder %s566_s11, %s773_s6 }
  0x1b   : > { %p570_p7 = pneg %p569_p6  ;;  %p574_p13 = por %p573_p10, %p572_p4 }
  0x1d   : > { %p576_p1 = por %p575_p12, %p574_p13 }
  0x1f   : > { %p577_p2 = pnand %p576_p1, %p570_p7 }
  0x21   : > { %580 = shalt.err (!%p577_p2)
}
  0x22   : > { %s581_s28 = scalar_lea.vmem %s775_s8, 128  ;;  %s680_s29 = smov [#allocation2]  }
  0x23   : > { %p582_p3 = scmp.ne.s32.totalorder %s775_s8, %s581_s28  ;;  %s586_s30 = sshll.u32 %s680_s29, 4  ;;  %s587_s30 = int_to_ptr.vmem [resolvable:$false] %s586_s30 }
  0x24   : > { %s588_s4 = scalar_lea.vmem %s587_s30, 256  ;;  %p589_p9 = scmp.lt.s32.totalorder %s775_s8, %s587_s30 }
  0x25   : > { %p584_p6 = pnand %p582_p3, %p568_p5  ;;  %p590_p4 = scmp.lt.s32.totalorder %s588_s4, %s581_s28 }
  0x27   : > { %p585_p11 = pneg %p584_p6  ;;  %p591_p10 = por %p590_p4, %p589_p9 }
  0x29   : > { %p592_p12 = pnand %p591_p10, %p585_p11 }
  0x2b   : > { %595 = shalt.err (!%p592_p12)
}
  0x2c   : > { %497 = dma.hbm_to_vmem [thread:$0]  (!%p779_p0), %s773_s6, 128, %s775_s8, %s158_s10  }
  0x2d   : > { %p903_p1 = scmp.lt.s32.totalorder %s678_s17, 3  ;;  %p904_p2 = scmp.ge.s32.totalorder %s678_s17, 1 }
  0x2f   : > { %p189_p5 = pnand %p904_p2, %p903_p1 }
  0x30   : > { %s815_s5 = sand.u32 (!%p189_p5), 1, %s662_s13  }
  0x31   : > { %192 = sbr.rel (%p189_p5) target bundleno = 222 (0xde), region = 32  ;;  %s482_s7 = sshll.u32 (!%p189_p5), %s815_s5, 3 }
  0x32   : > { %s195_s11 = scalar_lea.sflag (!%p189_p5), [#allocation3], %s815_s5  ;;  %s198_s18 = scalar_lea.vmem (!%p189_p5), [#allocation2], %s482_s7 }
  0x38   : > { %649 = dma.done.wait (%p751_p8), %s195_s11, 128  }
  0x39   : > { %651 = vsyncadd (%p751_p8), %s195_s11, 4294967168  ;;  %v681_v0 = vmov 0   ;;  %vm244_vm0 = vcmask 1043456   ;;  %v240_v1 = vld [vmem:[%s895_s2] sm:$0xf]  ;;  %p230_p8 = scmp.lt.s32.totalorder %s670_s15, 1  ;;  %v292_v37 = vlaneseq }
  0x3a   : > { %554 = vset.pattern.permute.xlu0 %v681_v0  ;;  %v238_v2 = vld [vmem:[%s198_s18] sm:$0xff]  ;;  %v682_v49 = vmov 0.0   ;;  %s486_s22 = sshll.u32 %s670_s15, 4  ;;  %s227_s23 = scalar_lea.vmem [#allocation5], %s815_s5 }
  0x3b   : > { %332 = vperm.xlu0 %554, %v240_v1   ;;  %v242_v3 = vcombine.high %v238_v2, %v238_v2  ;;  %v245_v4 = vsel %vm244_vm0, %v238_v2, -inf  ;;  %s231_s24 = scalar_select %p230_p8, %s670_s15, 1  ;;  %v293_v38 = vshrl.u32 %v292_v37, 7 }
  0x3c   : > { %v246_v5 = vrot.slane %v245_v4, 4  ;;  %s381_s28 = sshll.u32 %s227_s23, 4  ;;  %s844_s4 = scalar_lea.hbm %s896_s3, %s486_s22  ;;  %s846_s28 = int_to_ptr.vmem [resolvable:$true] %s381_s28 }
  0x3d   : > { %v252_v6 = vsel %vm244_vm0, %v242_v3, -inf  ;;  %s483_s9 = sshll.u32 %s231_s24, 1  ;;  %v296_v39 = vsub.s32 0, %v293_v38  ;;  %v300_v40 = vsub.s32 1, %v293_v38  ;;  %s368_s7 = scalar_lea.sflag [#allocation4], %s815_s5 }
  0x3e   : > { %v247_v7 = vmax.f32 %v245_v4, %v246_v5  ;;  %v253_v8 = vrot.slane %v252_v6, 4  ;;  %s236_s21 = scalar_lea.vmem %s894_s1, %s483_s9  ;;  %s596_s11 = scalar_lea.vmem %s846_s28, 16 }
  0x3f   : > { %v239_v41 = vld [vmem:[%s236_s21] sm:$0x3]  ;;  %p597_p9 = scmp.ne.s32.totalorder %s846_s28, %s596_s11  ;;  %p905_p11 = scmp.ne.s32.totalorder %s900_s25, 0 }
  0x40   : > { %v248_v9 = vrot.slane %v247_v7, 2  ;;  %v254_v10 = vmax.f32 %v252_v6, %v253_v8  ;;  %v297_v44 = vrot.slane %v239_v41, %v296_v39  ;;  %v301_v45 = vrot.slane %v239_v41, %v300_v40  ;;  %s683_s15 = smov [#allocation5]  }
  0x41   : > { %p598_p0 = pnand %p597_p9, %p905_p11  ;;  %s600_s18 = sshll.u32 %s683_s15, 4  ;;  %s601_s18 = int_to_ptr.vmem [resolvable:$false] %s600_s18 }
  0x42   : > { %v249_v11 = vmax.f32 %v247_v7, %v248_v9  ;;  %v255_v12 = vrot.slane %v254_v10, 2  ;;  %vm302_vm1 = vcmp.eq.s32.totalorder %v293_v38, %v297_v44  ;;  %vm303_vm2 = vcmp.eq.s32.totalorder %v293_v38, %v301_v45  ;;  %s602_s6 = scalar_lea.vmem %s601_s18, 32  ;;  %p603_p13 = scmp.lt.s32.totalorder %s846_s28, %s601_s18 }
  0x43   : > { %v484_v50 = vsel %vm302_vm1, 1.0, %v682_v49  ;;  %v485_v51 = vsel %vm303_vm2, 1.0, %v682_v49  ;;  %p599_p7 = pneg %p598_p0  ;;  %p604_p3 = scmp.lt.s32.totalorder %s602_s6, %s596_s11 }
  0x44   : > { %v250_v13 = vrot.slane %v249_v11, 1  ;;  %v256_v14 = vmax.f32 %v254_v10, %v255_v12  ;;  %v310_v53 = vcombine.low %v484_v50, %v485_v51 }
  0x45   : > { %p605_p6 = por %p604_p3, %p603_p13 }
  0x46   : > { %v251_v15 = vmax.f32 %v249_v11, %v250_v13  ;;  %v257_v16 = vrot.slane %v256_v14, 1 }
  0x47   : > { %p606_p4 = pnand %p605_p6, %p599_p7 }
  0x48   : > { %v258_v17 = vmax.f32 %v256_v14, %v257_v16 }
  0x4a   : > { %v261_v18 = vcombine.low %v251_v15, %v258_v17 }
  0x4c   : > { %v263_v19 = vsub.f32 %v238_v2, %v261_v18 }
  0x4e   : > { %v264_v20 = vmul.f32 1.442695, %v263_v19 }
  0x50   : > { %556 = vpow2.f32 %v264_v20 }
  0x5a   : > { %v557_v21 = vpop.eup %556 }
  0x5b   : > { %v267_v22 = vcombine.high %v557_v21, %v557_v21  ;;  %v269_v23 = vsel %vm244_vm0, %v557_v21, 0.0 }
  0x5c   : > { %v270_v24 = vrot.slane %v269_v23, 4 }
  0x5d   : > { %v276_v25 = vsel %vm244_vm0, %v267_v22, 0.0 }
  0x5e   : > { %v271_v26 = vadd.f32 %v270_v24, %v269_v23  ;;  %v277_v27 = vrot.slane %v276_v25, 4 }
  0x60   : > { %v272_v28 = vrot.slane %v271_v26, 2  ;;  %v278_v29 = vadd.f32 %v277_v27, %v276_v25 }
  0x62   : > { %v279_v30 = vrot.slane %v278_v29, 2  ;;  %v273_v31 = vadd.f32 %v272_v28, %v271_v26 }
  0x64   : > { %v280_v32 = vadd.f32 %v279_v30, %v278_v29  ;;  %v274_v33 = vrot.slane %v273_v31, 1 }
  0x66   : > { %v281_v34 = vrot.slane %v280_v32, 1  ;;  %v275_v35 = vadd.f32 %v274_v33, %v273_v31 }
  0x68   : > { %v282_v36 = vadd.f32 %v281_v34, %v280_v32  ;;  %558 = vlog2.f32 %v275_v35 }
  0x6a   : > { %560 = vlog2.f32 %v282_v36 }
  0x72   : > { %v559_v42 = vpop.eup %558 }
  0x73   : > { %v284_v46 = vmul.f32 0.6931472, %v559_v42 }
  0x74   : > { %v561_v43 = vpop.eup %560 }
  0x75   : > { %v286_v47 = vmul.f32 0.6931472, %v561_v43 }
  0x77   : > { %v289_v48 = vcombine.low %v284_v46, %v286_v47 }
  0x79   : > { %v291_v52 = vsub.f32 %v263_v19, %v289_v48 }
  0x7b   : > { %v312_v54 = vmul.f32 %v310_v53, %v291_v52 }
  0x7d   : > { %v314_v55 = vcombine.high %v312_v54, %v312_v54  ;;  %v316_v56 = vsel %vm244_vm0, %v312_v54, 0.0 }
  0x7e   : > { %v317_v58 = vrot.slane %v316_v56, 4 }
  0x7f   : > { %v323_v57 = vsel %vm244_vm0, %v314_v55, 0.0 }
  0x80   : > { %v324_v59 = vrot.slane %v323_v57, 4  ;;  %v318_v60 = vadd.f32 %v317_v58, %v316_v56 }
  0x82   : > { %v325_v61 = vadd.f32 %v324_v59, %v323_v57  ;;  %v319_v62 = vrot.slane %v318_v60, 2 }
  0x84   : > { %v326_v63 = vrot.slane %v325_v61, 2  ;;  %v320_v0 = vadd.f32 %v319_v62, %v318_v60 }
  0x86   : > { %v327_v1 = vadd.f32 %v326_v63, %v325_v61  ;;  %v321_v2 = vrot.slane %v320_v0, 1 }
  0x88   : > { %v328_v3 = vrot.slane %v327_v1, 1  ;;  %v322_v4 = vadd.f32 %v321_v2, %v320_v0 }
  0x8a   : > { %v329_v5 = vadd.f32 %v328_v3, %v327_v1  ;;  %v351_v6 = vmul.f32 1.442695, %v322_v4 }
  0x8c   : > { %v353_v7 = vmul.f32 1.442695, %v329_v5  ;;  %562 = vpow2.f32 %v351_v6 }
  0x8e   : > { %564 = vpow2.f32 %v353_v7 }
  0x96   : > { %v563_v8 = vpop.eup %562 }
  0x97   : > { %v355_v17 = vsub.f32 1.0, %v563_v8 }
  0x98   : > { %v565_v10 = vpop.eup %564 }
  0x99   : > { %v356_v18 = vsub.f32 1.0, %v565_v10  ;;  %v357_v23 = vmul.f32 %v355_v17, %v355_v17 }
  0x9b   : > { %v358_v24 = vmul.f32 %v356_v18, %v356_v18  ;;  %v359_v29 = vsub.f32 0.0, %v357_v23 }
  0x9d   : > { %v360_v30 = vsub.f32 0.0, %v358_v24 }
  0xba   : > { %v333_v9 = vpop.permute.xlu0 %332 }
  0xbb   : > { %v335_v11 = vmul.f32 %v484_v50, %v333_v9  ;;  %v336_v12 = vmul.f32 %v485_v51, %v333_v9 }
  0xbd   : > { %v337_v13 = vsel %vm244_vm0, %v335_v11, 0.0  ;;  %v344_v14 = vsel %vm244_vm0, %v336_v12, 0.0 }
  0xbe   : > { %v338_v15 = vrot.slane %v337_v13, 4  ;;  %v345_v16 = vrot.slane %v344_v14, 4 }
  0xc0   : > { %v339_v19 = vadd.f32 %v338_v15, %v337_v13  ;;  %v346_v20 = vadd.f32 %v345_v16, %v344_v14 }
  0xc2   : > { %v340_v21 = vrot.slane %v339_v19, 2  ;;  %v347_v22 = vrot.slane %v346_v20, 2 }
  0xc4   : > { %v341_v25 = vadd.f32 %v340_v21, %v339_v19  ;;  %v348_v26 = vadd.f32 %v347_v22, %v346_v20 }
  0xc6   : > { %v342_v27 = vrot.slane %v341_v25, 1  ;;  %v349_v28 = vrot.slane %v348_v26, 1 }
  0xc8   : > { %v343_v31 = vadd.f32 %v342_v27, %v341_v25  ;;  %v350_v32 = vadd.f32 %v349_v28, %v348_v26 }
  0xca   : > { %v361_v33 = vmul.f32 %v359_v29, %v343_v31  ;;  %v362_v34 = vmul.f32 %v360_v30, %v350_v32 }
  0xcc   : > { %v363_v35 = vmul.f32 %v361_v33, %v322_v4  ;;  %v364_v36 = vmul.f32 %v362_v34, %v329_v5 }
  0xce   : > { %v365_v37 = vadd.f32 %v364_v36, %v363_v35 }
  0xd0   : > { %366 = vst [vmem:[%s227_s23] sm:$0x1] %v365_v37 }
  0xd1   : > { %609 = shalt.err (!%p606_p4)
}
  0xd2   : > { %s610_s5 = scalar_lea.hbm %s844_s4, 16  ;;  %s614_s9 = scalar_lea.hbm %s896_s3, 32 }
  0xd3   : > { %p611_p10 = scmp.ne.s32.totalorder %s844_s4, %s610_s5  ;;  %p615_p2 = scmp.lt.u32.totalorder %s844_s4, %s896_s3 }
  0xd4   : > { %p616_p5 = scmp.lt.u32.totalorder %s614_s9, %s610_s5  ;;  %p618_p9 = scmp.lt.u32.totalorder %s610_s5, %s844_s4 }
  0xd5   : > { %p612_p12 = pnand %p611_p10, %p905_p11 }
  0xd6   : > { %p617_p8 = por %p616_p5, %p615_p2 }
  0xd7   : > { %p613_p1 = pneg %p612_p12 }
  0xd8   : > { %p619_p0 = por %p618_p9, %p617_p8 }
  0xda   : > { %p620_p7 = pnand %p619_p0, %p613_p1 }
  0xdc   : > { %623 = shalt.err (!%p620_p7)
}
  0xdd   : > { %492 = dma.vmem_to_hbm [thread:$0]  (%p905_p11), %s846_s28, 16, %s844_s4, %s368_s7  }
  0xde PF: > { %s393_s21 = sand.u32 1, %s658_s12   ;;  %p906_p13 = scmp.ne.s32.totalorder %s901_s27, 0 }
  0xdf   : > { %p907_p3 = scmp.ge.s32.totalorder %s678_s17, 2  ;;  %s394_s22 = scalar_lea.sflag [#allocation4], %s393_s21 }
  0xe1   : > { %p499_p6 = pnand %p907_p3, %p906_p13 }
  0xe3   : > { %653 = dma.done.wait (!%p499_p6), %s394_s22, 16  }
  0xe4   : > { %655 = vsyncadd (!%p499_p6), %s394_s22, 4294967280  ;;  %s19_s17 = sadd.s32 1, %s678_s17   ;;  %s908_s12 = smov %s662_s13 }
  0xe5   : > { %p16_p4 = scmp.ge.s32.totalorder %s19_s17, 4   ;;  %s909_s13 = smov %s666_s14 }
  0xe6   : > { %s910_s14 = smov %s760_s26  ;;  %s911_s15 = smov %s674_s16 }
  0xe7   : > { %s912_s16 = smov %s914_s20  ;;  %18 = sbr.rel (!%p16_p4) target bundleno = 6 (0x6), region = 80 }
  0xee   :  { %398 = vsyncpa [#allocation3], 1 }
  0xef   :  { %400 = vsyncpa [#allocation3 + $0x1], 1 }
  0xf0   :  { %401 = vsyncpa [#allocation4], 1 }
  0xf1   :  { %403 = vsyncpa [#allocation4 + $0x1], 1 }

</bundles_post_ra>
